<compile_context>
chip_gen: v5e
topology: v5e:2x2
jax: 0.10.0
libtpu: 0.0.40
codegen_flags: <defaults>
</compile_context>

<pallas_src>
import functools

import jax
import jax.numpy as jnp
from jax.experimental import pallas as pl
from jax.experimental.pallas import tpu as pltpu

LANE = 128


def _round_up(v, m):
    return (v + m - 1) // m * m


def _encoder_kernel(x_ref, y_ref,
                    w1x_ref, w1y_ref, b1_ref,
                    w2_ref, b2_ref,
                    w3_ref, b3_ref,
                    w4_ref, b4_ref,
                    o_ref):
    """One grid step: a (tm, x_dim)+(tm, y_dim) row tile through the 4-layer MLP."""
    mxu_dtype = w1x_ref.dtype  # bf16 for the MXU; accumulate in f32

    # Layer 1 -- concat-free: [x | y] @ W1 == x @ W1x + y @ W1y.
    h = (jnp.dot(x_ref[...].astype(mxu_dtype), w1x_ref[...],
                 preferred_element_type=jnp.float32)
         + jnp.dot(y_ref[...].astype(mxu_dtype), w1y_ref[...],
                   preferred_element_type=jnp.float32)
         + b1_ref[...])
    h = jnp.maximum(h, 0.0)                       # ReLU in f32 (VPU)

    h = jnp.dot(h.astype(mxu_dtype), w2_ref[...],
                preferred_element_type=jnp.float32) + b2_ref[...]
    h = jnp.maximum(h, 0.0)

    h = jnp.dot(h.astype(mxu_dtype), w3_ref[...],
                preferred_element_type=jnp.float32) + b3_ref[...]
    h = jnp.maximum(h, 0.0)

    h = jnp.dot(h.astype(mxu_dtype), w4_ref[...],
                preferred_element_type=jnp.float32) + b4_ref[...]

    o_ref[...] = h.astype(o_ref.dtype)


def _pick_tile_m(M, footprint_bytes, tile_m=None, budget=32 * 1024 * 1024):
    """Largest row tile (multiple of 8, default sweep 512→8) fitting the VMEM budget."""
    m8 = _round_up(M, 8)
    if tile_m is not None:
        return min(_round_up(tile_m, 8), m8)
    for cand in (512, 256, 128, 64, 32, 16, 8):
        if cand <= m8 and footprint_bytes(cand) <= budget:
            return cand
    return min(m8, 8)


@functools.partial(jax.jit, static_argnames=("r_dim", "tile_m"))
def encoder_forward(x, y, prepared, *, r_dim, tile_m=None):
    """x: (B, N, x_dim), y: (B, N, y_dim) -> (B, N, r_dim)."""
    w1x, w1y, b1, w2, b2, w3, b3, w4, b4 = prepared
    B, N, x_dim = x.shape
    y_dim = y.shape[2]
    r_pad = w2.shape[1]                       # lane-padded hidden width
    act_bytes = x.dtype.itemsize
    w_bytes = w2.dtype.itemsize

    M = B * N

    def footprint(tm):
        # double-buffered streamed operands (rows in, rows out)
        stream = 2 * tm * (x_dim + y_dim) * act_bytes + 2 * tm * r_pad * act_bytes
        # single-buffered resident weights + biases
        resident = ((x_dim + y_dim + 3 * r_pad) * r_pad * w_bytes
                    + 4 * r_pad * 4)
        # live f32 activation chain inside the kernel body
        live = 4 * tm * r_pad * 4
        return stream + resident + live

    tm = _pick_tile_m(M, footprint, tile_m)
    M_pad = _round_up(M, tm)

    x2 = x.reshape(M, x_dim)
    y2 = y.reshape(M, y_dim)
    if M_pad != M:                            # ragged row count -> zero-pad rows
        x2 = jnp.pad(x2, ((0, M_pad - M), (0, 0)))
        y2 = jnp.pad(y2, ((0, M_pad - M), (0, 0)))

    grid = (M_pad // tm,)

    flops = 2 * M_pad * ((x_dim + y_dim) * r_pad + 3 * r_pad * r_pad)
    bytes_accessed = (
        (x2.size + y2.size) * act_bytes
        + (w1x.size + w1y.size + w2.size + w3.size + w4.size) * w_bytes
        + (b1.size + b2.size + b3.size + b4.size) * 4
        + M_pad * r_pad * act_bytes)

    est = footprint(tm)
    vmem_limit = int(min(max(2 * est, 32 * 1024 * 1024), 56 * 1024 * 1024))

    # Grid-invariant weights/biases: whole array resident in VMEM, 1 buffer.
    wspec = pl.BlockSpec(memory_space=pltpu.MemorySpace.VMEM)

    out = pl.pallas_call(
        _encoder_kernel,
        out_shape=jax.ShapeDtypeStruct((M_pad, r_pad), x.dtype),
        grid_spec=pltpu.PrefetchScalarGridSpec(
            num_scalar_prefetch=0,
            grid=grid,
            in_specs=[
                pl.BlockSpec((tm, x_dim), lambda i: (i, 0)),   # x rows
                pl.BlockSpec((tm, y_dim), lambda i: (i, 0)),   # y rows
            ] + [wspec] * 9,                                   # W1x,W1y,b1..W4,b4
            out_specs=pl.BlockSpec((tm, r_pad), lambda i: (i, 0)),
        ),
        compiler_params=pltpu.CompilerParams(
            dimension_semantics=("parallel",),
            vmem_limit_bytes=vmem_limit,
        ),
        cost_estimate=pl.CostEstimate(
            flops=int(flops), transcendentals=0,
            bytes_accessed=int(bytes_accessed)),
    )(x2, y2, w1x, w1y, b1, w2, b2, w3, b3, w4, b4)

    return out[:M, :r_dim].reshape(B, N, r_dim)


def init_encoder_params(key, x_dim, r_dim, y_dim, dtype=jnp.float32):
    """PyTorch-style Linear init: U(-1/sqrt(fan_in), 1/sqrt(fan_in)).

    Weights are stored as (in_features, out_features) == torch weight.T.
    """
    dims = [(x_dim + y_dim, r_dim), (r_dim, r_dim), (r_dim, r_dim), (r_dim, r_dim)]
    params = []
    for (fan_in, fan_out) in dims:
        key, kw, kb = jax.random.split(key, 3)
        bound = 1.0 / jnp.sqrt(jnp.asarray(fan_in, dtype=jnp.float32))
        w = jax.random.uniform(kw, (fan_in, fan_out), dtype, -bound, bound)
        b = jax.random.uniform(kb, (fan_out,), dtype, -bound, bound)
        params += [w, b]
    return tuple(params)


def prepare_encoder_params(params, x_dim, *, mxu_dtype=jnp.bfloat16):
    """Split W1 (concat-free layer 1), lane-pad r_dim to 128, cast weights to bf16."""
    w1, b1, w2, b2, w3, b3, w4, b4 = params
    d_in, r_dim = w1.shape
    r_pad = _round_up(r_dim, LANE)
    pr = r_pad - r_dim

    def pad_hidden_w(w):
        return jnp.pad(w, ((0, pr), (0, pr))).astype(mxu_dtype)

    def pad_b(b):
        return jnp.pad(b.reshape(1, -1), ((0, 0), (0, pr))).astype(jnp.float32)

    w1x = jnp.pad(w1[:x_dim], ((0, 0), (0, pr))).astype(mxu_dtype)
    w1y = jnp.pad(w1[x_dim:], ((0, 0), (0, pr))).astype(mxu_dtype)
    return (w1x, w1y, pad_b(b1),
            pad_hidden_w(w2), pad_b(b2),
            pad_hidden_w(w3), pad_b(b3),
            pad_hidden_w(w4), pad_b(b4))


def encoder_reference(x, y, params):
    """Pure-JAX f32 reference matching the PyTorch forward exactly."""
    w1, b1, w2, b2, w3, b3, w4, b4 = params
    out = jnp.concatenate([x, y], axis=2)
    out = jnp.maximum(out @ w1 + b1, 0.0)
    out = jnp.maximum(out @ w2 + b2, 0.0)
    out = jnp.maximum(out @ w3 + b3, 0.0)
    out = out @ w4 + b4
    return out


def encoder_reference_mxu(x, y, prepared, r_dim):
    """Pure-JAX reference mirroring the kernel's bf16-MXU / f32-accumulate math."""
    w1x, w1y, b1, w2, b2, w3, b3, w4, b4 = prepared
    B, N, x_dim = x.shape
    xb = x.reshape(B * N, x_dim).astype(w1x.dtype)
    yb = y.reshape(B * N, -1).astype(w1y.dtype)
    h = (jnp.dot(xb, w1x, preferred_element_type=jnp.float32)
         + jnp.dot(yb, w1y, preferred_element_type=jnp.float32) + b1)
    h = jnp.maximum(h, 0.0)
    for w, b in ((w2, b2), (w3, b3)):
        h = jnp.dot(h.astype(w.dtype), w, preferred_element_type=jnp.float32) + b
        h = jnp.maximum(h, 0.0)
    h = jnp.dot(h.astype(w4.dtype), w4, preferred_element_type=jnp.float32) + b4
    return h[:, :r_dim].reshape(B, N, r_dim)


def _run_case(B, N, x_dim, y_dim, r_dim, key):
    kx, ky, kp = jax.random.split(key, 3)
    x = jax.random.normal(kx, (B, N, x_dim), jnp.float32)
    y = jax.random.normal(ky, (B, N, y_dim), jnp.float32)
    params = init_encoder_params(kp, x_dim, r_dim, y_dim)
    prepared = prepare_encoder_params(params, x_dim)

    out = encoder_forward(x, y, prepared, r_dim=r_dim)
    out = jax.block_until_ready(out)
    assert out.shape == (B, N, r_dim), out.shape

    # Tight check vs. a reference that mirrors the kernel's bf16/f32 math.
    ref_mxu = encoder_reference_mxu(x, y, prepared, r_dim)
    assert jnp.allclose(out, ref_mxu, atol=5e-3, rtol=5e-3), "mismatch vs MXU reference"

    # Looser semantic check vs. the exact f32 PyTorch-equivalent forward.
    ref_f32 = encoder_reference(x, y, params)
    assert jnp.allclose(out, ref_f32, atol=1e-1, rtol=1e-1), "mismatch vs f32 reference"
    return out


if __name__ == "__main__":
    key = jax.random.PRNGKey(0)

    # Small shapes consistent with the module's forward: x (B, N, x_dim), y (B, N, y_dim).
    _run_case(B=2, N=8, x_dim=4, y_dim=4, r_dim=32, key=jax.random.fold_in(key, 0))

    # Larger ragged case: exercises multi-step grid, row padding and lane padding.
    _run_case(B=4, N=200, x_dim=4, y_dim=4, r_dim=64, key=jax.random.fold_in(key, 1))

    print("KERNEL_OK")
</pallas_src>

<mosaic_0001>
module attributes {stable_mosaic.version = 11 : i64} {
  func.func @_encoder_kernel(%arg0: i32, %arg1: memref<16x4xf32, #tpu.memory_space<vmem>>, %arg2: memref<16x4xf32, #tpu.memory_space<vmem>>, %arg3: memref<4x128xbf16, #tpu.memory_space<vmem>>, %arg4: memref<4x128xbf16, #tpu.memory_space<vmem>>, %arg5: memref<1x128xf32, #tpu.memory_space<vmem>>, %arg6: memref<128x128xbf16, #tpu.memory_space<vmem>>, %arg7: memref<1x128xf32, #tpu.memory_space<vmem>>, %arg8: memref<128x128xbf16, #tpu.memory_space<vmem>>, %arg9: memref<1x128xf32, #tpu.memory_space<vmem>>, %arg10: memref<128x128xbf16, #tpu.memory_space<vmem>>, %arg11: memref<1x128xf32, #tpu.memory_space<vmem>>, %arg12: memref<16x128xf32, #tpu.memory_space<vmem>>) attributes {dimension_semantics = [#tpu.dimension_semantics<parallel>], iteration_bounds = array<i64: 1>, scalar_prefetch = 0 : i64, scratch_operands = 0 : i64, tpu.core_type = #tpu.core_type<tc>, window_params = [{transform_indices = @transform_0, window_bounds = array<i64: 16, 4>}, {transform_indices = @transform_1, window_bounds = array<i64: 16, 4>}, {pipeline_mode = #tpu.pipeline_mode<synchronous>, transform_indices = @transform_2, window_bounds = array<i64: 4, 128>}, {pipeline_mode = #tpu.pipeline_mode<synchronous>, transform_indices = @transform_3, window_bounds = array<i64: 4, 128>}, {pipeline_mode = #tpu.pipeline_mode<synchronous>, transform_indices = @transform_4, window_bounds = array<i64: 1, 128>}, {pipeline_mode = #tpu.pipeline_mode<synchronous>, transform_indices = @transform_5, window_bounds = array<i64: 128, 128>}, {pipeline_mode = #tpu.pipeline_mode<synchronous>, transform_indices = @transform_6, window_bounds = array<i64: 1, 128>}, {pipeline_mode = #tpu.pipeline_mode<synchronous>, transform_indices = @transform_7, window_bounds = array<i64: 128, 128>}, {pipeline_mode = #tpu.pipeline_mode<synchronous>, transform_indices = @transform_8, window_bounds = array<i64: 1, 128>}, {pipeline_mode = #tpu.pipeline_mode<synchronous>, transform_indices = @transform_9, window_bounds = array<i64: 128, 128>}, {pipeline_mode = #tpu.pipeline_mode<synchronous>, transform_indices = @transform_10, window_bounds = array<i64: 1, 128>}, {transform_indices = @transform_11, window_bounds = array<i64: 16, 128>}]} {
    %c0 = arith.constant 0 : index
    %c0_0 = arith.constant 0 : index
    %0 = vector.load %arg1[%c0, %c0_0] : memref<16x4xf32, #tpu.memory_space<vmem>>, vector<16x4xf32>
    %1 = arith.truncf %0 : vector<16x4xf32> to vector<16x4xbf16>
    %c0_1 = arith.constant 0 : index
    %c0_2 = arith.constant 0 : index
    %2 = vector.load %arg3[%c0_1, %c0_2] : memref<4x128xbf16, #tpu.memory_space<vmem>>, vector<4x128xbf16>
    %cst = arith.constant dense<0.000000e+00> : vector<16x128xf32>
    %3 = tpu.matmul %1, %2, %cst {dimension_numbers = #tpu.dot_dimension_numbers<[1], [0], [0], [1], [0, 0, 1, 1], [], []>} : vector<16x4xbf16>, vector<4x128xbf16>, vector<16x128xf32> -> vector<16x128xf32>
    %c0_3 = arith.constant 0 : index
    %c0_4 = arith.constant 0 : index
    %4 = vector.load %arg2[%c0_3, %c0_4] : memref<16x4xf32, #tpu.memory_space<vmem>>, vector<16x4xf32>
    %5 = arith.truncf %4 : vector<16x4xf32> to vector<16x4xbf16>
    %c0_5 = arith.constant 0 : index
    %c0_6 = arith.constant 0 : index
    %6 = vector.load %arg4[%c0_5, %c0_6] : memref<4x128xbf16, #tpu.memory_space<vmem>>, vector<4x128xbf16>
    %cst_7 = arith.constant dense<0.000000e+00> : vector<16x128xf32>
    %7 = tpu.matmul %5, %6, %cst_7 {dimension_numbers = #tpu.dot_dimension_numbers<[1], [0], [0], [1], [0, 0, 1, 1], [], []>} : vector<16x4xbf16>, vector<4x128xbf16>, vector<16x128xf32> -> vector<16x128xf32>
    %8 = arith.addf %3, %7 : vector<16x128xf32>
    %c0_8 = arith.constant 0 : index
    %c0_9 = arith.constant 0 : index
    %9 = vector.load %arg5[%c0_8, %c0_9] : memref<1x128xf32, #tpu.memory_space<vmem>>, vector<1x128xf32>
    %10 = vector.broadcast %9 : vector<1x128xf32> to vector<16x128xf32>
    %11 = arith.addf %8, %10 : vector<16x128xf32>
    %cst_10 = arith.constant 0.000000e+00 : f32
    %12 = vector.broadcast %cst_10 : f32 to vector<16x128xf32>
    %13 = arith.maximumf %11, %12 : vector<16x128xf32>
    %14 = arith.truncf %13 : vector<16x128xf32> to vector<16x128xbf16>
    %c0_11 = arith.constant 0 : index
    %c0_12 = arith.constant 0 : index
    %15 = vector.load %arg6[%c0_11, %c0_12] : memref<128x128xbf16, #tpu.memory_space<vmem>>, vector<128x128xbf16>
    %cst_13 = arith.constant dense<0.000000e+00> : vector<16x128xf32>
    %16 = tpu.matmul %14, %15, %cst_13 {dimension_numbers = #tpu.dot_dimension_numbers<[1], [0], [0], [1], [0, 0, 1, 1], [], []>} : vector<16x128xbf16>, vector<128x128xbf16>, vector<16x128xf32> -> vector<16x128xf32>
    %c0_14 = arith.constant 0 : index
    %c0_15 = arith.constant 0 : index
    %17 = vector.load %arg7[%c0_14, %c0_15] : memref<1x128xf32, #tpu.memory_space<vmem>>, vector<1x128xf32>
    %18 = vector.broadcast %17 : vector<1x128xf32> to vector<16x128xf32>
    %19 = arith.addf %16, %18 : vector<16x128xf32>
    %cst_16 = arith.constant 0.000000e+00 : f32
    %20 = vector.broadcast %cst_16 : f32 to vector<16x128xf32>
    %21 = arith.maximumf %19, %20 : vector<16x128xf32>
    %22 = arith.truncf %21 : vector<16x128xf32> to vector<16x128xbf16>
    %c0_17 = arith.constant 0 : index
    %c0_18 = arith.constant 0 : index
    %23 = vector.load %arg8[%c0_17, %c0_18] : memref<128x128xbf16, #tpu.memory_space<vmem>>, vector<128x128xbf16>
    %cst_19 = arith.constant dense<0.000000e+00> : vector<16x128xf32>
    %24 = tpu.matmul %22, %23, %cst_19 {dimension_numbers = #tpu.dot_dimension_numbers<[1], [0], [0], [1], [0, 0, 1, 1], [], []>} : vector<16x128xbf16>, vector<128x128xbf16>, vector<16x128xf32> -> vector<16x128xf32>
    %c0_20 = arith.constant 0 : index
    %c0_21 = arith.constant 0 : index
    %25 = vector.load %arg9[%c0_20, %c0_21] : memref<1x128xf32, #tpu.memory_space<vmem>>, vector<1x128xf32>
    %26 = vector.broadcast %25 : vector<1x128xf32> to vector<16x128xf32>
    %27 = arith.addf %24, %26 : vector<16x128xf32>
    %cst_22 = arith.constant 0.000000e+00 : f32
    %28 = vector.broadcast %cst_22 : f32 to vector<16x128xf32>
    %29 = arith.maximumf %27, %28 : vector<16x128xf32>
    %30 = arith.truncf %29 : vector<16x128xf32> to vector<16x128xbf16>
    %c0_23 = arith.constant 0 : index
    %c0_24 = arith.constant 0 : index
    %31 = vector.load %arg10[%c0_23, %c0_24] : memref<128x128xbf16, #tpu.memory_space<vmem>>, vector<128x128xbf16>
    %cst_25 = arith.constant dense<0.000000e+00> : vector<16x128xf32>
    %32 = tpu.matmul %30, %31, %cst_25 {dimension_numbers = #tpu.dot_dimension_numbers<[1], [0], [0], [1], [0, 0, 1, 1], [], []>} : vector<16x128xbf16>, vector<128x128xbf16>, vector<16x128xf32> -> vector<16x128xf32>
    %c0_26 = arith.constant 0 : index
    %c0_27 = arith.constant 0 : index
    %33 = vector.load %arg11[%c0_26, %c0_27] : memref<1x128xf32, #tpu.memory_space<vmem>>, vector<1x128xf32>
    %34 = vector.broadcast %33 : vector<1x128xf32> to vector<16x128xf32>
    %35 = arith.addf %32, %34 : vector<16x128xf32>
    %c0_28 = arith.constant 0 : index
    %c0_29 = arith.constant 0 : index
    %36 = vector.load %arg12[%c0_28, %c0_29] : memref<16x128xf32, #tpu.memory_space<vmem>>, vector<16x128xf32>
    tpu.vector_store %arg12[%c0_28, %c0_29], %35 {strides = array<i32>} : memref<16x128xf32, #tpu.memory_space<vmem>>, vector<16x128xf32>,
    return
  }
  func.func @transform_0(%arg0: i32) -> (i32, i32) {
    %c0_i32 = arith.constant 0 : i32
    %c0_i32_0 = arith.constant 0 : i32
    return %arg0, %c0_i32 : i32, i32
  }
  func.func @transform_1(%arg0: i32) -> (i32, i32) {
    %c0_i32 = arith.constant 0 : i32
    %c0_i32_0 = arith.constant 0 : i32
    return %arg0, %c0_i32 : i32, i32
  }
  func.func @transform_2(%arg0: i32) -> (i32, i32) {
    %c0_i32 = arith.constant 0 : i32
    %c0_i32_0 = arith.constant 0 : i32
    %c0_i32_1 = arith.constant 0 : i32
    return %c0_i32, %c0_i32_0 : i32, i32
  }
  func.func @transform_3(%arg0: i32) -> (i32, i32) {
    %c0_i32 = arith.constant 0 : i32
    %c0_i32_0 = arith.constant 0 : i32
    %c0_i32_1 = arith.constant 0 : i32
    return %c0_i32, %c0_i32_0 : i32, i32
  }
  func.func @transform_4(%arg0: i32) -> (i32, i32) {
    %c0_i32 = arith.constant 0 : i32
    %c0_i32_0 = arith.constant 0 : i32
    %c0_i32_1 = arith.constant 0 : i32
    return %c0_i32, %c0_i32_0 : i32, i32
  }
  func.func @transform_5(%arg0: i32) -> (i32, i32) {
    %c0_i32 = arith.constant 0 : i32
    %c0_i32_0 = arith.constant 0 : i32
    %c0_i32_1 = arith.constant 0 : i32
    return %c0_i32, %c0_i32_0 : i32, i32
  }
  func.func @transform_6(%arg0: i32) -> (i32, i32) {
    %c0_i32 = arith.constant 0 : i32
    %c0_i32_0 = arith.constant 0 : i32
    %c0_i32_1 = arith.constant 0 : i32
    return %c0_i32, %c0_i32_0 : i32, i32
  }
  func.func @transform_7(%arg0: i32) -> (i32, i32) {
    %c0_i32 = arith.constant 0 : i32
    %c0_i32_0 = arith.constant 0 : i32
    %c0_i32_1 = arith.constant 0 : i32
    return %c0_i32, %c0_i32_0 : i32, i32
  }
  func.func @transform_8(%arg0: i32) -> (i32, i32) {
    %c0_i32 = arith.constant 0 : i32
    %c0_i32_0 = arith.constant 0 : i32
    %c0_i32_1 = arith.constant 0 : i32
    return %c0_i32, %c0_i32_0 : i32, i32
  }
  func.func @transform_9(%arg0: i32) -> (i32, i32) {
    %c0_i32 = arith.constant 0 : i32
    %c0_i32_0 = arith.constant 0 : i32
    %c0_i32_1 = arith.constant 0 : i32
    return %c0_i32, %c0_i32_0 : i32, i32
  }
  func.func @transform_10(%arg0: i32) -> (i32, i32) {
    %c0_i32 = arith.constant 0 : i32
    %c0_i32_0 = arith.constant 0 : i32
    %c0_i32_1 = arith.constant 0 : i32
    return %c0_i32, %c0_i32_0 : i32, i32
  }
  func.func @transform_11(%arg0: i32) -> (i32, i32) {
    %c0_i32 = arith.constant 0 : i32
    %c0_i32_0 = arith.constant 0 : i32
    return %arg0, %c0_i32 : i32, i32
  }
}

</mosaic_0001>

<bundles_post_ra>
// kernel: encoder_forward.1
= control target key start
LH: loop header
LB: loop body
LE: loop exit
PB: predicated region body
PF: predicated region fallthrough
CT: control target
= control target key end

     0   :  { %16 = vsyncpa [#allocation3], 0  ;;  %s722_s0 = inlined_call_operand.vmem [shape: f32[16,4], index: 0, kind: input, shape index: {}]   ;;  %s723_s1 = inlined_call_operand.vmem [shape: f32[16,4], index: 1, kind: input, shape index: {}]   ;;  %s724_s2 = inlined_call_operand.vmem [shape: bf16[4,128], index: 2, kind: input, shape index: {}]   ;;  %s725_s3 = inlined_call_operand.vmem [shape: bf16[4,128], index: 3, kind: input, shape index: {}]   ;;  %s726_s4 = inlined_call_operand.vmem [shape: f32[1,128], index: 4, kind: input, shape index: {}]   ;;  %s727_s5 = inlined_call_operand.hbm [shape: bf16[128,128], index: 5, kind: input, shape index: {}]   ;;  %s728_s6 = inlined_call_operand.vmem [shape: f32[1,128], index: 6, kind: input, shape index: {}]   ;;  %s729_s7 = inlined_call_operand.hbm [shape: bf16[128,128], index: 7, kind: input, shape index: {}]   ;;  %s730_s8 = inlined_call_operand.vmem [shape: f32[1,128], index: 8, kind: input, shape index: {}]   ;;  %s731_s9 = inlined_call_operand.hbm [shape: bf16[128,128], index: 9, kind: input, shape index: {}]   ;;  %s732_s10 = inlined_call_operand.vmem [shape: f32[1,128], index: 10, kind: input, shape index: {}]   ;;  %s733_s11 = inlined_call_operand.vmem [shape: f32[16,128], index: 11, kind: output, shape index: {}]  }
   0x1   :  { %17 = vsyncpa [#allocation5], 0  ;;  %s47_s19 = sshll.u32 %s729_s7, 4  ;;  %s612_s20 = smov [#allocation4]   ;;  %s48_s19 = int_to_ptr.hbm [resolvable:$true] %s47_s19 }
   0x2   :  { %s49_s21 = sshll.u32 %s612_s20, 4  ;;  %s32_s24 = sshll.u32 %s727_s5, 4  ;;  %s50_s21 = int_to_ptr.vmem [resolvable:$true] %s49_s21  ;;  %s33_s24 = int_to_ptr.hbm [resolvable:$true] %s32_s24 }
   0x3   :  { %s613_s25 = smov 64   ;;  %s614_s26 = smov 4  }
   0x4   :  { %55 = dma.hbm_to_vmem [thread:$0]  %s48_s19, 1024, %s50_s21, [#allocation5], %s613_s25, %s613_s25, %s614_s26  }
   0x5   :  { %s615_s27 = smov [#allocation2]   ;;  %s62_s12 = sshll.u32 %s731_s9, 4  ;;  %s63_s12 = int_to_ptr.hbm [resolvable:$true] %s62_s12 }
   0x6   :  { %s34_s28 = sshll.u32 %s615_s27, 4  ;;  %s616_s7 = smov [#allocation6]   ;;  %s35_s28 = int_to_ptr.vmem [resolvable:$true] %s34_s28 }
   0x7   :  { %40 = dma.hbm_to_vmem [thread:$0]  %s33_s24, 1024, %s35_s28, [#allocation3], %s613_s25, %s613_s25, %s614_s26  }
   0x8   :  { %s64_s13 = sshll.u32 %s616_s7, 4  ;;  %s65_s13 = int_to_ptr.vmem [resolvable:$true] %s64_s13 }
   0x9   :  { %70 = dma.hbm_to_vmem [thread:$0]  %s63_s12, 1024, %s65_s13, [#allocation5], %s613_s25, %s613_s25, %s614_s26  }
   0xa   :  { %608 = dma.done.wait [#allocation3], 1024  }
   0xb   :  { %609 = vsyncadd [#allocation3], 4294966272 }
   0xc   :  { %610 = dma.done.wait [#allocation5], 2048  }
   0xd   :  { %611 = vsyncadd [#allocation5], 4294965248  ;;  %vm98_vm0 = vcmask 1041408   ;;  %v93_v0 = vld [vmem:[%s725_s3] sm:$0x3]  ;;  %v91_v2 = vld [vmem:[%s723_s1 + $0x8] sm:$0xff] }
   0xe   :  { %v90_v1 = vld [vmem:[%s723_s1] sm:$0xff]  ;;  %v100_v3 = vsel %vm98_vm0, %v93_v0, 0  ;;  %vm94_vm1 = vcmask 31744   ;;  %v87_v8 = vld [vmem:[%s722_s0 + $0x8] sm:$0xff]  ;;  %v510_v10 = vld [vmem:[#allocation2 + $0x38] sm:$0xff] }
   0xf   :  { %v92_v4 = vpack.c.bf16 %v91_v2, %v90_v1  ;;  %v89_v5 = vld [vmem:[%s724_s2] sm:$0x3]  ;;  %109 = vmatpush.bf16.msra.mxu1 %v100_v3  ;;  %213 = vmatpush.bf16.msra.mxu2 %v510_v10  ;;  %v509_v11 = vld [vmem:[#allocation2 + $0x30] sm:$0xff]  ;;  %v508_v12 = vld [vmem:[#allocation2 + $0x28] sm:$0xff] }
  0x10   :  { %v120_v6 = vsel %vm98_vm0, %v89_v5, 0  ;;  %v86_v7 = vld [vmem:[%s722_s0] sm:$0xff]  ;;  %v506_v14 = vld [vmem:[#allocation2 + $0x18] sm:$0xff]  ;;  %v505_v15 = vld [vmem:[#allocation2 + $0x10] sm:$0xff] }
  0x11   :  { %v88_v9 = vpack.c.bf16 %v87_v8, %v86_v7  ;;  %v507_v13 = vld [vmem:[#allocation2 + $0x20] sm:$0xff]  ;;  %v504_v16 = vld [vmem:[#allocation2 + $0x8] sm:$0xff]  ;;  %v518_v19 = vld [vmem:[#allocation4 + $0x38] sm:$0xff] }
  0x12   :  { %405 = vmatmul.msk.bf16.vlgmr.msra.gmra.mxu1 %vm94_vm1, %v92_v4  ;;  %v503_v17 = vld [vmem:[#allocation2] sm:$0xff]  ;;  %298 = vmatpush.bf16.msra.mxu3 %v518_v19  ;;  %v517_v20 = vld [vmem:[#allocation4 + $0x30] sm:$0xff]  ;;  %v516_v21 = vld [vmem:[#allocation4 + $0x28] sm:$0xff] }
  0x13   :  { %129 = vmatpush.bf16.msrb.mxu1 %v120_v6  ;;  %214 = vmatpush.bf16.msra.mxu2 %v509_v11  ;;  %v515_v23 = vld [vmem:[#allocation4 + $0x20] sm:$0xff]  ;;  %v514_v34 = vld [vmem:[#allocation4 + $0x18] sm:$0xff]  ;;  %v513_v35 = vld [vmem:[#allocation4 + $0x10] sm:$0xff] }
  0x14   :  { %v532_v26 = vld [vmem:[%s726_s4] ss:$0 sm:$0xff]  ;;  %v512_v36 = vld [vmem:[#allocation4 + $0x8] sm:$0xff]  ;;  %v526_v38 = vld [vmem:[#allocation6 + $0x38] sm:$0xff] }
  0x15   :  { %v511_v37 = vld [vmem:[#allocation4] sm:$0xff]  ;;  %383 = vmatpush.bf16.msra.mxu0 %v526_v38  ;;  %v525_v39 = vld [vmem:[#allocation6 + $0x30] sm:$0xff]  ;;  %v524_v40 = vld [vmem:[#allocation6 + $0x28] sm:$0xff] }
  0x16   :  { %299 = vmatpush.bf16.msra.mxu3 %v517_v20  ;;  %v523_v41 = vld [vmem:[#allocation6 + $0x20] sm:$0xff]  ;;  %v522_v50 = vld [vmem:[#allocation6 + $0x18] sm:$0xff]  ;;  %v521_v51 = vld [vmem:[#allocation6 + $0x10] sm:$0xff] }
  0x17   :  { %215 = vmatpush.bf16.msra.mxu2 %v508_v12  ;;  %v533_v43 = vld [vmem:[%s728_s6] ss:$0 sm:$0xff]  ;;  %v520_v52 = vld [vmem:[#allocation6 + $0x8] sm:$0xff] }
  0x18   :  { %v519_v53 = vld [vmem:[#allocation6] sm:$0xff] }
  0x19   :  { %384 = vmatpush.bf16.msra.mxu0 %v525_v39  ;;  %v534_v55 = vld [vmem:[%s730_s8] ss:$0 sm:$0xff] }
  0x1a   :  { %300 = vmatpush.bf16.msra.mxu3 %v516_v21  ;;  %v535_v62 = vld [vmem:[%s732_s10] ss:$0 sm:$0xff] }
  0x1b   :  { %216 = vmatpush.bf16.msra.mxu2 %v507_v13 }
  0x1d   :  { %385 = vmatpush.bf16.msra.mxu0 %v524_v40 }
  0x1e   :  { %301 = vmatpush.bf16.msra.mxu3 %v515_v23 }
  0x1f   :  { %217 = vmatpush.bf16.msra.mxu2 %v506_v14 }
  0x21   :  { %386 = vmatpush.bf16.msra.mxu0 %v523_v41 }
  0x22   :  { %406 = vmatmul.msk.bf16.vlgmr.msrb.gmra.mxu1 %vm94_vm1, %v88_v9  ;;  %302 = vmatpush.bf16.msra.mxu3 %v514_v34 }
  0x23   :  { %218 = vmatpush.bf16.msra.mxu2 %v505_v15 }
  0x25   :  { %387 = vmatpush.bf16.msra.mxu0 %v522_v50 }
  0x26   :  { %303 = vmatpush.bf16.msra.mxu3 %v513_v35 }
  0x27   :  { %219 = vmatpush.bf16.msra.mxu2 %v504_v16 }
  0x29   :  { %388 = vmatpush.bf16.msra.mxu0 %v521_v51 }
  0x2a   :  { %304 = vmatpush.bf16.msra.mxu3 %v512_v36 }
  0x2b   :  { %220 = vmatpush.bf16.msra.mxu2 %v503_v17 }
  0x2d   :  { %389 = vmatpush.bf16.msra.mxu0 %v520_v52 }
  0x2e   :  { %305 = vmatpush.bf16.msra.mxu3 %v511_v37 }
  0x31   :  { %390 = vmatpush.bf16.msra.mxu0 %v519_v53 }
  0x8f   :  { %v111_v18 = vpop.f32.mrf.mxu1 }
  0x97   :  { %v113_v22 = vpop.f32.mrf.mxu1 }
  0x9f   :  { %v131_v24 = vpop.f32.mrf.mxu1 }
  0xa0   :  { %v132_v25 = vadd.f32 %v131_v24, %v111_v18 }
  0xa2   :  { %v140_v28 = vadd.f32 %v532_v26, %v132_v25 }
  0xa4   :  { %v142_v31 = vmax.f32 %v140_v28, 0.0 }
  0xa7   :  { %v133_v27 = vpop.f32.mrf.mxu1 }
  0xa8   :  { %v134_v29 = vadd.f32 %v133_v27, %v113_v22 }
  0xaa   :  { %v141_v30 = vadd.f32 %v532_v26, %v134_v29 }
  0xac   :  { %v143_v32 = vmax.f32 %v141_v30, 0.0 }
  0xae   :  { %v144_v33 = vpack.c.bf16 %v143_v32, %v142_v31 }
  0xb0   :  { %221 = vmatmul.bf16.vlgmr.msra.gmra.mxu2 %v144_v33 }
 0x133   :  { %v222_v42 = vpop.f32.mrf.mxu2 }
 0x134   :  { %v223_v44 = vadd.f32 %v533_v43, %v222_v42 }
 0x136   :  { %v227_v47 = vmax.f32 %v223_v44, 0.0 }
 0x13b   :  { %v224_v45 = vpop.f32.mrf.mxu2 }
 0x13c   :  { %v225_v46 = vadd.f32 %v533_v43, %v224_v45 }
 0x13e   :  { %v228_v48 = vmax.f32 %v225_v46, 0.0 }
 0x140   :  { %v229_v49 = vpack.c.bf16 %v228_v48, %v227_v47 }
 0x142   :  { %306 = vmatmul.bf16.vlgmr.msra.gmra.mxu3 %v229_v49 }
 0x1c5   :  { %v307_v54 = vpop.f32.mrf.mxu3 }
 0x1c6   :  { %v308_v56 = vadd.f32 %v534_v55, %v307_v54 }
 0x1c8   :  { %v312_v59 = vmax.f32 %v308_v56, 0.0 }
 0x1cd   :  { %v309_v57 = vpop.f32.mrf.mxu3 }
 0x1ce   :  { %v310_v58 = vadd.f32 %v534_v55, %v309_v57 }
 0x1d0   :  { %v313_v60 = vmax.f32 %v310_v58, 0.0 }
 0x1d2   :  { %v314_v61 = vpack.c.bf16 %v313_v60, %v312_v59 }
 0x1d4   :  { %391 = vmatmul.bf16.vlgmr.msra.gmra.mxu0 %v314_v61 }
 0x251   :  { %v392_v63 = vpop.f32.mrf.mxu0 }
 0x252   :  { %v393_v0 = vadd.f32 %v535_v62, %v392_v63 }
 0x254   :  { %397 = vst [vmem:[%s733_s11] sm:$0xff] %v393_v0 }
 0x259   :  { %v394_v1 = vpop.f32.mrf.mxu0 }
 0x25a   :  { %v395_v2 = vadd.f32 %v535_v62, %v394_v1 }
 0x25c   :  { %398 = vst [vmem:[%s733_s11 + $0x8] sm:$0xff] %v395_v2 }
 0x25d   :  { %403 = vsyncpa [#allocation3], 1 }
 0x25e   :  { %404 = vsyncpa [#allocation5], 1 }

</bundles_post_ra>
